<compile_context>
chip_gen: v6e
topology: v6e:2x2x1
jax: 0.10.0
libtpu: 0.0.40
codegen_flags: <defaults>
</compile_context>

<pallas_src>
import jax
import jax.numpy as jnp
import numpy as np
from jax.experimental import pallas as pl
from jax.experimental.pallas import tpu as pltpu


# --------------------------------------------------------------------------------------
# helpers
# --------------------------------------------------------------------------------------
def _pick_group(B, L, target=512):
    """Pick a batch-group size G (divisor of B) so the lane tile G*L is a multiple of 128.

    Falls back to the whole batch in one tile (block == full array, always legal)."""
    cands = [g for g in range(1, B + 1) if B % g == 0 and (g * L) % 128 == 0]
    if not cands:
        return B
    for g in cands:
        if g * L >= target:
            return g
    return cands[-1]


def _build_fused_weight(conv_ws, w_cb, kss, pmax):
    """Fuse all K-tap conv weights + the maxpool-branch 1x1 conv into one matrix.

    Returns W of shape (C_out, ntaps*bneck + ni), f32, such that
      y = W @ concat([shifted_bottleneck(d) for d in -pmax..pmax] + [maxpooled_x])
    reproduces torch.cat([convs_i(bottleneck(x))] + [conv_bottle(x)], dim=1)."""
    ntaps = 2 * pmax + 1
    nk = len(kss)
    nf, bneck = conv_ws[0].shape[1], conv_ws[0].shape[2]
    ni = w_cb.shape[1]
    c_out = nf * (nk + 1)
    W = jnp.zeros((c_out, ntaps * bneck + ni), jnp.float32)
    for i, (w, ks) in enumerate(zip(conv_ws, kss)):
        p = (ks - 1) // 2
        for j in range(ks):
            t = j - p + pmax  # shared tap slot for offset d = j - p
            W = W.at[i * nf:(i + 1) * nf, t * bneck:(t + 1) * bneck].set(w[j])
    W = W.at[nk * nf:, ntaps * bneck:].set(w_cb)
    return W


# --------------------------------------------------------------------------------------
# kernels
# --------------------------------------------------------------------------------------
def _make_main_kernel(L, pmax):
    """Main kernel: bottleneck dot + fused im2col/maxpool dot + streaming BN partial stats."""

    def kernel(x_ref, wb_ref, wbig_ref, y_ref, stats_ref):
        x = x_ref[...]                                   # (ni, T), T = G*L lanes
        T = x.shape[1]
        # per-sample lane position (batch is folded into lanes, one length-L segment per sample)
        pos = jax.lax.broadcasted_iota(jnp.int32, (1, T), 1) % L

        # ---- bottleneck 1x1 conv: one wide MXU dot over the whole lane tile ----
        bott = jnp.dot(wb_ref[...], x, preferred_element_type=jnp.float32)   # (bneck, T) f32
        bott = bott.astype(x.dtype)

        def shift_lanes(v, d):
            # s[:, l] = v[:, l + d]  (zeros shifted in); static slices -> lane shifts in vregs
            if d == 0:
                return v
            c = v.shape[0]
            if d > 0:
                return jnp.concatenate([v[:, d:], jnp.zeros((c, d), v.dtype)], axis=1)
            return jnp.concatenate([jnp.zeros((c, -d), v.dtype), v[:, :d]], axis=1)

        # ---- im2col over shared tap offsets (zero "same" padding via per-sample masks) ----
        zero_b = jnp.zeros_like(bott)
        blocks = []
        for d in range(-pmax, pmax + 1):
            valid = jnp.logical_and(pos + d >= 0, pos + d < L)
            blocks.append(jnp.where(valid, shift_lanes(bott, d), zero_b))

        # ---- MaxPool1d(3, stride=1, padding=1): in-register neighbours, edges fall back to x ----
        xl = jnp.where(pos >= 1, shift_lanes(x, -1), x)      # x[l-1]
        xr = jnp.where(pos <= L - 2, shift_lanes(x, 1), x)   # x[l+1]
        mp = jnp.maximum(jnp.maximum(xl, x), xr)             # (ni, T)

        # ---- single fused dot: all K-size branches + maxpool 1x1 branch at once ----
        rhs = jnp.concatenate(blocks + [mp], axis=0)         # (ntaps*bneck + ni, T)
        y = jnp.dot(wbig_ref[...], rhs, preferred_element_type=jnp.float32)  # (C_out, T) f32

        # single aligned full-tile store (C_out rows, multiple of 8)
        y_ref[...] = y

        # ---- streaming BN stats: per-channel sum / sum-of-squares while y is live in vregs ----
        s1 = jnp.sum(y, axis=1, keepdims=True)               # (C_out, 1)
        s2 = jnp.sum(y * y, axis=1, keepdims=True)           # (C_out, 1)
        stats_ref[0] = jnp.concatenate([s1, s2], axis=1)     # (C_out, 2)

    return kernel


def _bn_relu_kernel(y_ref, scale_ref, shift_ref, o_ref):
    # y * scale + shift, then ReLU  (scale/shift are per-channel, broadcast over lanes)
    o_ref[...] = jnp.maximum(y_ref[...] * scale_ref[...] + shift_ref[...], 0.0)


# --------------------------------------------------------------------------------------
# wrapper
# --------------------------------------------------------------------------------------
def inception_block_forward(x, w_bottle, conv_ws, w_cb, kss, gamma=None, beta=None,
                            eps=1e-5, compute_dtype=jnp.bfloat16):
    B, ni, L = x.shape
    bneck = w_bottle.shape[0]
    nf = w_cb.shape[0]
    nk = len(kss)
    pmax = max((ks - 1) // 2 for ks in kss)
    ntaps = 2 * pmax + 1
    c_out = nf * (nk + 1)
    BL = B * L

    if gamma is None:
        gamma = jnp.ones((c_out,), jnp.float32)
    if beta is None:
        beta = jnp.zeros((c_out,), jnp.float32)

    # ---- wrapper-side layout plumbing: fold batch into the lane dimension ----
    x2d = jnp.transpose(x, (1, 0, 2)).reshape(ni, BL).astype(compute_dtype)       # (ni, B*L)
    wb = w_bottle.astype(compute_dtype)                                            # (bneck, ni)
    wbig = _build_fused_weight(conv_ws, w_cb, kss, pmax).astype(compute_dtype)     # (C_out, K_big)
    k_big = ntaps * bneck + ni

    # grid over batch groups: lane tiles are aligned to whole samples -> no halo exchange
    G = _pick_group(B, L)
    n_g = B // G
    T = G * L

    # ---- kernel 1: branches + concat + partial BN stats ----
    y_pre, stats = pl.pallas_call(
        _make_main_kernel(L, pmax),
        grid=(n_g,),
        in_specs=[
            pl.BlockSpec((ni, T), lambda t: (0, t)),
            pl.BlockSpec((bneck, ni), lambda t: (0, 0)),
            pl.BlockSpec((c_out, k_big), lambda t: (0, 0)),
        ],
        out_specs=(
            pl.BlockSpec((c_out, T), lambda t: (0, t)),
            pl.BlockSpec((1, c_out, 2), lambda t: (t, 0, 0)),
        ),
        out_shape=(
            jax.ShapeDtypeStruct((c_out, BL), jnp.float32),
            jax.ShapeDtypeStruct((n_g, c_out, 2), jnp.float32),
        ),
        compiler_params=pltpu.CompilerParams(dimension_semantics=("parallel",)),
    )(x2d, wb, wbig)

    # ---- tiny O(C_out) glue: finalize training-mode batch statistics -> scale / shift ----
    tot = jnp.sum(stats, axis=0)                      # (C_out, 2)
    mean = tot[:, 0] / BL
    var = jnp.maximum(tot[:, 1] / BL - mean * mean, 0.0)
    inv = jax.lax.rsqrt(var + eps)
    scale = (gamma * inv).astype(jnp.float32).reshape(c_out, 1)
    shift = (beta - mean * gamma * inv).astype(jnp.float32).reshape(c_out, 1)

    # ---- kernel 2: apply BN (scale/shift) + ReLU, tiled over the same lane grid ----
    y = pl.pallas_call(
        _bn_relu_kernel,
        grid=(n_g,),
        in_specs=[
            pl.BlockSpec((c_out, T), lambda t: (0, t)),
            pl.BlockSpec((c_out, 1), lambda t: (0, 0)),
            pl.BlockSpec((c_out, 1), lambda t: (0, 0)),
        ],
        out_specs=pl.BlockSpec((c_out, T), lambda t: (0, t)),
        out_shape=jax.ShapeDtypeStruct((c_out, BL), jnp.float32),
        compiler_params=pltpu.CompilerParams(dimension_semantics=("parallel",)),
    )(y_pre, scale, shift)

    # back to PyTorch NCL layout
    return jnp.transpose(y.reshape(c_out, B, L), (1, 0, 2))


# --------------------------------------------------------------------------------------
# pure-JAX reference (mirrors the kernel's dtype handling for apples-to-apples checks)
# --------------------------------------------------------------------------------------
def ref_forward(x, w_bottle, conv_ws, w_cb, kss, gamma, beta, eps=1e-5,
                compute_dtype=jnp.float32):
    B, ni, L = x.shape
    f32 = jnp.float32
    xc = x.astype(compute_dtype).astype(f32)
    wb = w_bottle.astype(compute_dtype).astype(f32)
    bott = jnp.einsum('oc,bcl->bol', wb, xc)
    bott = bott.astype(compute_dtype).astype(f32)
    outs = []
    for w, ks in zip(conv_ws, kss):
        p = (ks - 1) // 2
        wcd = w.astype(compute_dtype).astype(f32)
        bp = jnp.pad(bott, ((0, 0), (0, 0), (p, p)))
        acc = sum(jnp.einsum('oc,bcl->bol', wcd[j], bp[:, :, j:j + L]) for j in range(ks))
        outs.append(acc)
    xp = jnp.pad(xc, ((0, 0), (0, 0), (1, 1)), constant_values=-jnp.inf)
    mp = jnp.maximum(jnp.maximum(xp[..., 0:L], xp[..., 1:1 + L]), xp[..., 2:2 + L])
    outs.append(jnp.einsum('oc,bcl->bol', w_cb.astype(compute_dtype).astype(f32), mp))
    cat = jnp.concatenate(outs, axis=1)
    mean = jnp.mean(cat, axis=(0, 2), keepdims=True)
    var = jnp.mean((cat - mean) ** 2, axis=(0, 2), keepdims=True)
    yn = (cat - mean) * jax.lax.rsqrt(var + eps)
    yn = yn * gamma[None, :, None] + beta[None, :, None]
    return jnp.maximum(yn, 0.0)


# --------------------------------------------------------------------------------------
# test
# --------------------------------------------------------------------------------------
if __name__ == "__main__":
    # InceptionBlock1d(ni=4, nb_filters=4, kss=(7,5,3), d=0, stride=1, bottleneck_size=8)
    # applied to x of shape (B, ni, L) = (2, 4, 16).
    B, ni, L = 2, 4, 16
    bneck, nf = 8, 4
    kss = (7, 5, 3)
    c_out = nf * (len(kss) + 1)

    key = jax.random.PRNGKey(0)
    k_x, k_wb, k_wc, k_cb = jax.random.split(key, 4)
    x = jax.random.normal(k_x, (B, ni, L), jnp.float32)
    w_bottle = 0.3 * jax.random.normal(k_wb, (bneck, ni), jnp.float32)        # Conv1d(ni,bneck,1), no bias
    conv_keys = jax.random.split(k_wc, len(kss))
    conv_ws = [0.2 * jax.random.normal(kk, (ks, nf, bneck), jnp.float32)      # Conv1d(bneck,nf,ks), no bias
               for kk, ks in zip(conv_keys, kss)]
    w_cb = 0.3 * jax.random.normal(k_cb, (nf, ni), jnp.float32)               # Conv1d(ni,nf,1), no bias
    gamma = jnp.ones((c_out,), jnp.float32)                                   # BatchNorm1d default init
    beta = jnp.zeros((c_out,), jnp.float32)

    # bf16 MXU path (default)
    out_bf16 = inception_block_forward(x, w_bottle, conv_ws, w_cb, kss, gamma, beta,
                                       compute_dtype=jnp.bfloat16)
    out_bf16 = jax.block_until_ready(out_bf16)
    ref_bf16 = ref_forward(x, w_bottle, conv_ws, w_cb, kss, gamma, beta,
                           compute_dtype=jnp.bfloat16)
    np.testing.assert_allclose(np.asarray(out_bf16), np.asarray(ref_bf16), rtol=1e-2, atol=1e-2)

    # f32 path (tight check of the kernel logic)
    out_f32 = inception_block_forward(x, w_bottle, conv_ws, w_cb, kss, gamma, beta,
                                      compute_dtype=jnp.float32)
    out_f32 = jax.block_until_ready(out_f32)
    ref_f32 = ref_forward(x, w_bottle, conv_ws, w_cb, kss, gamma, beta,
                          compute_dtype=jnp.float32)
    np.testing.assert_allclose(np.asarray(out_f32), np.asarray(ref_f32), rtol=2e-3, atol=2e-3)

    print("KERNEL_OK")
</pallas_src>

<mosaic_0001>
module attributes {stable_mosaic.version = 11 : i64} {
  func.func @kernel(%arg0: i32, %arg1: memref<4x32xbf16, #tpu.memory_space<vmem>>, %arg2: memref<8x4xbf16, #tpu.memory_space<vmem>>, %arg3: memref<16x60xbf16, #tpu.memory_space<vmem>>, %arg4: memref<16x32xf32, #tpu.memory_space<vmem>>, %arg5: memref<1x16x2xf32, #tpu.memory_space<vmem>>) attributes {dimension_semantics = [#tpu.dimension_semantics<parallel>], iteration_bounds = array<i64: 1>, scalar_prefetch = 0 : i64, scratch_operands = 0 : i64, tpu.core_type = #tpu.core_type<tc>, window_params = [{transform_indices = @transform_0, window_bounds = array<i64: 4, 32>}, {pipeline_mode = #tpu.pipeline_mode<synchronous>, transform_indices = @transform_1, window_bounds = array<i64: 8, 4>}, {pipeline_mode = #tpu.pipeline_mode<synchronous>, transform_indices = @transform_2, window_bounds = array<i64: 16, 60>}, {transform_indices = @transform_3, window_bounds = array<i64: 16, 32>}, {transform_indices = @transform_4, window_bounds = array<i64: 1, 16, 2>}]} {
    %c0 = arith.constant 0 : index
    %c0_0 = arith.constant 0 : index
    %0 = vector.load %arg1[%c0, %c0_0] : memref<4x32xbf16, #tpu.memory_space<vmem>>, vector<4x32xbf16>
    %1 = tpu.iota {dimensions = array<i32: 1>} : vector<1x32xi32>
    %c16_i32 = arith.constant 16 : i32
    %c0_i32 = arith.constant 0 : i32
    %2 = arith.cmpi eq, %c16_i32, %c0_i32 : i32
    %c1_i32 = arith.constant 1 : i32
    %3 = arith.select %2, %c1_i32, %c16_i32 : i32
    %4 = vector.broadcast %3 : i32 to vector<1x32xi32>
    %5 = arith.remsi %1, %4 : vector<1x32xi32>
    %c0_i32_1 = arith.constant 0 : i32
    %6 = vector.broadcast %c0_i32_1 : i32 to vector<1x32xi32>
    %7 = arith.cmpi ne, %5, %6 : vector<1x32xi32>
    %c0_i32_2 = arith.constant 0 : i32
    %8 = vector.broadcast %c0_i32_2 : i32 to vector<1x32xi32>
    %9 = arith.cmpi slt, %5, %8 : vector<1x32xi32>
    %c0_i32_3 = arith.constant 0 : i32
    %10 = arith.cmpi slt, %3, %c0_i32_3 : i32
    %11 = vector.broadcast %10 : i1 to vector<1x32xi1>
    %12 = vector.broadcast %11 : vector<1x32xi1> to vector<1x32xi1>
    %13 = arith.xori %9, %12 : vector<1x32xi1>
    %14 = arith.andi %13, %7 : vector<1x32xi1>
    %15 = vector.broadcast %3 : i32 to vector<1x32xi32>
    %16 = arith.addi %5, %15 : vector<1x32xi32>
    %17 = arith.select %14, %16, %5 : vector<1x32xi1>, vector<1x32xi32>
    %c0_4 = arith.constant 0 : index
    %c0_5 = arith.constant 0 : index
    %18 = vector.load %arg2[%c0_4, %c0_5] : memref<8x4xbf16, #tpu.memory_space<vmem>>, vector<8x4xbf16>
    %cst = arith.constant dense<0.000000e+00> : vector<8x32xf32>
    %19 = tpu.matmul %18, %0, %cst {dimension_numbers = #tpu.dot_dimension_numbers<[1], [0], [0], [1], [0, 0, 1, 1], [], []>} : vector<8x4xbf16>, vector<4x32xbf16>, vector<8x32xf32> -> vector<8x32xf32>
    %20 = arith.truncf %19 : vector<8x32xf32> to vector<8x32xbf16>
    %cst_6 = arith.constant 0.000000e+00 : bf16
    %21 = vector.broadcast %cst_6 : bf16 to vector<8x32xbf16>
    %c-3_i32 = arith.constant -3 : i32
    %22 = vector.broadcast %c-3_i32 : i32 to vector<1x32xi32>
    %23 = arith.addi %17, %22 : vector<1x32xi32>
    %c0_i32_7 = arith.constant 0 : i32
    %24 = vector.broadcast %c0_i32_7 : i32 to vector<1x32xi32>
    %25 = arith.cmpi sge, %23, %24 : vector<1x32xi32>
    %c-3_i32_8 = arith.constant -3 : i32
    %26 = vector.broadcast %c-3_i32_8 : i32 to vector<1x32xi32>
    %27 = arith.addi %17, %26 : vector<1x32xi32>
    %c16_i32_9 = arith.constant 16 : i32
    %28 = vector.broadcast %c16_i32_9 : i32 to vector<1x32xi32>
    %29 = arith.cmpi slt, %27, %28 : vector<1x32xi32>
    %30 = arith.andi %25, %29 : vector<1x32xi1>
    %cst_10 = arith.constant 0.000000e+00 : bf16
    %31 = vector.broadcast %cst_10 : bf16 to vector<8x3xbf16>
    %32 = vector.extract_strided_slice %20 {offsets = [0, 0], sizes = [8, 29], strides = [1, 1]} : vector<8x32xbf16> to vector<8x29xbf16>
    %33 = tpu.concatenate %31, %32 in 1 : vector<8x3xbf16>, vector<8x29xbf16> -> vector<8x32xbf16>
    %34 = vector.shape_cast %30 : vector<1x32xi1> to vector<1x32xi1>
    %35 = vector.broadcast %34 : vector<1x32xi1> to vector<8x32xi1>
    %36 = arith.select %35, %33, %21 : vector<8x32xi1>, vector<8x32xbf16>
    %c-2_i32 = arith.constant -2 : i32
    %37 = vector.broadcast %c-2_i32 : i32 to vector<1x32xi32>
    %38 = arith.addi %17, %37 : vector<1x32xi32>
    %c0_i32_11 = arith.constant 0 : i32
    %39 = vector.broadcast %c0_i32_11 : i32 to vector<1x32xi32>
    %40 = arith.cmpi sge, %38, %39 : vector<1x32xi32>
    %c-2_i32_12 = arith.constant -2 : i32
    %41 = vector.broadcast %c-2_i32_12 : i32 to vector<1x32xi32>
    %42 = arith.addi %17, %41 : vector<1x32xi32>
    %c16_i32_13 = arith.constant 16 : i32
    %43 = vector.broadcast %c16_i32_13 : i32 to vector<1x32xi32>
    %44 = arith.cmpi slt, %42, %43 : vector<1x32xi32>
    %45 = arith.andi %40, %44 : vector<1x32xi1>
    %cst_14 = arith.constant 0.000000e+00 : bf16
    %46 = vector.broadcast %cst_14 : bf16 to vector<8x2xbf16>
    %47 = vector.extract_strided_slice %20 {offsets = [0, 0], sizes = [8, 30], strides = [1, 1]} : vector<8x32xbf16> to vector<8x30xbf16>
    %48 = tpu.concatenate %46, %47 in 1 : vector<8x2xbf16>, vector<8x30xbf16> -> vector<8x32xbf16>
    %49 = vector.shape_cast %45 : vector<1x32xi1> to vector<1x32xi1>
    %50 = vector.broadcast %49 : vector<1x32xi1> to vector<8x32xi1>
    %51 = arith.select %50, %48, %21 : vector<8x32xi1>, vector<8x32xbf16>
    %c-1_i32 = arith.constant -1 : i32
    %52 = vector.broadcast %c-1_i32 : i32 to vector<1x32xi32>
    %53 = arith.addi %17, %52 : vector<1x32xi32>
    %c0_i32_15 = arith.constant 0 : i32
    %54 = vector.broadcast %c0_i32_15 : i32 to vector<1x32xi32>
    %55 = arith.cmpi sge, %53, %54 : vector<1x32xi32>
    %c-1_i32_16 = arith.constant -1 : i32
    %56 = vector.broadcast %c-1_i32_16 : i32 to vector<1x32xi32>
    %57 = arith.addi %17, %56 : vector<1x32xi32>
    %c16_i32_17 = arith.constant 16 : i32
    %58 = vector.broadcast %c16_i32_17 : i32 to vector<1x32xi32>
    %59 = arith.cmpi slt, %57, %58 : vector<1x32xi32>
    %60 = arith.andi %55, %59 : vector<1x32xi1>
    %cst_18 = arith.constant 0.000000e+00 : bf16
    %61 = vector.broadcast %cst_18 : bf16 to vector<8x1xbf16>
    %62 = vector.extract_strided_slice %20 {offsets = [0, 0], sizes = [8, 31], strides = [1, 1]} : vector<8x32xbf16> to vector<8x31xbf16>
    %63 = tpu.concatenate %61, %62 in 1 : vector<8x1xbf16>, vector<8x31xbf16> -> vector<8x32xbf16>
    %64 = vector.shape_cast %60 : vector<1x32xi1> to vector<1x32xi1>
    %65 = vector.broadcast %64 : vector<1x32xi1> to vector<8x32xi1>
    %66 = arith.select %65, %63, %21 : vector<8x32xi1>, vector<8x32xbf16>
    %c0_i32_19 = arith.constant 0 : i32
    %67 = vector.broadcast %c0_i32_19 : i32 to vector<1x32xi32>
    %68 = arith.addi %17, %67 : vector<1x32xi32>
    %c0_i32_20 = arith.constant 0 : i32
    %69 = vector.broadcast %c0_i32_20 : i32 to vector<1x32xi32>
    %70 = arith.cmpi sge, %68, %69 : vector<1x32xi32>
    %c0_i32_21 = arith.constant 0 : i32
    %71 = vector.broadcast %c0_i32_21 : i32 to vector<1x32xi32>
    %72 = arith.addi %17, %71 : vector<1x32xi32>
    %c16_i32_22 = arith.constant 16 : i32
    %73 = vector.broadcast %c16_i32_22 : i32 to vector<1x32xi32>
    %74 = arith.cmpi slt, %72, %73 : vector<1x32xi32>
    %75 = arith.andi %70, %74 : vector<1x32xi1>
    %76 = vector.shape_cast %75 : vector<1x32xi1> to vector<1x32xi1>
    %77 = vector.broadcast %76 : vector<1x32xi1> to vector<8x32xi1>
    %78 = arith.select %77, %20, %21 : vector<8x32xi1>, vector<8x32xbf16>
    %c1_i32_23 = arith.constant 1 : i32
    %79 = vector.broadcast %c1_i32_23 : i32 to vector<1x32xi32>
    %80 = arith.addi %17, %79 : vector<1x32xi32>
    %c0_i32_24 = arith.constant 0 : i32
    %81 = vector.broadcast %c0_i32_24 : i32 to vector<1x32xi32>
    %82 = arith.cmpi sge, %80, %81 : vector<1x32xi32>
    %c1_i32_25 = arith.constant 1 : i32
    %83 = vector.broadcast %c1_i32_25 : i32 to vector<1x32xi32>
    %84 = arith.addi %17, %83 : vector<1x32xi32>
    %c16_i32_26 = arith.constant 16 : i32
    %85 = vector.broadcast %c16_i32_26 : i32 to vector<1x32xi32>
    %86 = arith.cmpi slt, %84, %85 : vector<1x32xi32>
    %87 = arith.andi %82, %86 : vector<1x32xi1>
    %88 = vector.extract_strided_slice %20 {offsets = [0, 1], sizes = [8, 31], strides = [1, 1]} : vector<8x32xbf16> to vector<8x31xbf16>
    %cst_27 = arith.constant 0.000000e+00 : bf16
    %89 = vector.broadcast %cst_27 : bf16 to vector<8x1xbf16>
    %90 = tpu.concatenate %88, %89 in 1 : vector<8x31xbf16>, vector<8x1xbf16> -> vector<8x32xbf16>
    %91 = vector.shape_cast %87 : vector<1x32xi1> to vector<1x32xi1>
    %92 = vector.broadcast %91 : vector<1x32xi1> to vector<8x32xi1>
    %93 = arith.select %92, %90, %21 : vector<8x32xi1>, vector<8x32xbf16>
    %c2_i32 = arith.constant 2 : i32
    %94 = vector.broadcast %c2_i32 : i32 to vector<1x32xi32>
    %95 = arith.addi %17, %94 : vector<1x32xi32>
    %c0_i32_28 = arith.constant 0 : i32
    %96 = vector.broadcast %c0_i32_28 : i32 to vector<1x32xi32>
    %97 = arith.cmpi sge, %95, %96 : vector<1x32xi32>
    %c2_i32_29 = arith.constant 2 : i32
    %98 = vector.broadcast %c2_i32_29 : i32 to vector<1x32xi32>
    %99 = arith.addi %17, %98 : vector<1x32xi32>
    %c16_i32_30 = arith.constant 16 : i32
    %100 = vector.broadcast %c16_i32_30 : i32 to vector<1x32xi32>
    %101 = arith.cmpi slt, %99, %100 : vector<1x32xi32>
    %102 = arith.andi %97, %101 : vector<1x32xi1>
    %103 = vector.extract_strided_slice %20 {offsets = [0, 2], sizes = [8, 30], strides = [1, 1]} : vector<8x32xbf16> to vector<8x30xbf16>
    %cst_31 = arith.constant 0.000000e+00 : bf16
    %104 = vector.broadcast %cst_31 : bf16 to vector<8x2xbf16>
    %105 = tpu.concatenate %103, %104 in 1 : vector<8x30xbf16>, vector<8x2xbf16> -> vector<8x32xbf16>
    %106 = vector.shape_cast %102 : vector<1x32xi1> to vector<1x32xi1>
    %107 = vector.broadcast %106 : vector<1x32xi1> to vector<8x32xi1>
    %108 = arith.select %107, %105, %21 : vector<8x32xi1>, vector<8x32xbf16>
    %c3_i32 = arith.constant 3 : i32
    %109 = vector.broadcast %c3_i32 : i32 to vector<1x32xi32>
    %110 = arith.addi %17, %109 : vector<1x32xi32>
    %c0_i32_32 = arith.constant 0 : i32
    %111 = vector.broadcast %c0_i32_32 : i32 to vector<1x32xi32>
    %112 = arith.cmpi sge, %110, %111 : vector<1x32xi32>
    %c3_i32_33 = arith.constant 3 : i32
    %113 = vector.broadcast %c3_i32_33 : i32 to vector<1x32xi32>
    %114 = arith.addi %17, %113 : vector<1x32xi32>
    %c16_i32_34 = arith.constant 16 : i32
    %115 = vector.broadcast %c16_i32_34 : i32 to vector<1x32xi32>
    %116 = arith.cmpi slt, %114, %115 : vector<1x32xi32>
    %117 = arith.andi %112, %116 : vector<1x32xi1>
    %118 = vector.extract_strided_slice %20 {offsets = [0, 3], sizes = [8, 29], strides = [1, 1]} : vector<8x32xbf16> to vector<8x29xbf16>
    %cst_35 = arith.constant 0.000000e+00 : bf16
    %119 = vector.broadcast %cst_35 : bf16 to vector<8x3xbf16>
    %120 = tpu.concatenate %118, %119 in 1 : vector<8x29xbf16>, vector<8x3xbf16> -> vector<8x32xbf16>
    %121 = vector.shape_cast %117 : vector<1x32xi1> to vector<1x32xi1>
    %122 = vector.broadcast %121 : vector<1x32xi1> to vector<8x32xi1>
    %123 = arith.select %122, %120, %21 : vector<8x32xi1>, vector<8x32xbf16>
    %c1_i32_36 = arith.constant 1 : i32
    %124 = vector.broadcast %c1_i32_36 : i32 to vector<1x32xi32>
    %125 = arith.cmpi sge, %17, %124 : vector<1x32xi32>
    %cst_37 = arith.constant 0.000000e+00 : bf16
    %126 = vector.broadcast %cst_37 : bf16 to vector<4x1xbf16>
    %127 = vector.extract_strided_slice %0 {offsets = [0, 0], sizes = [4, 31], strides = [1, 1]} : vector<4x32xbf16> to vector<4x31xbf16>
    %128 = tpu.concatenate %126, %127 in 1 : vector<4x1xbf16>, vector<4x31xbf16> -> vector<4x32xbf16>
    %129 = vector.shape_cast %125 : vector<1x32xi1> to vector<1x32xi1>
    %130 = vector.broadcast %129 : vector<1x32xi1> to vector<4x32xi1>
    %131 = arith.select %130, %128, %0 : vector<4x32xi1>, vector<4x32xbf16>
    %c14_i32 = arith.constant 14 : i32
    %132 = vector.broadcast %c14_i32 : i32 to vector<1x32xi32>
    %133 = arith.cmpi sle, %17, %132 : vector<1x32xi32>
    %134 = vector.extract_strided_slice %0 {offsets = [0, 1], sizes = [4, 31], strides = [1, 1]} : vector<4x32xbf16> to vector<4x31xbf16>
    %cst_38 = arith.constant 0.000000e+00 : bf16
    %135 = vector.broadcast %cst_38 : bf16 to vector<4x1xbf16>
    %136 = tpu.concatenate %134, %135 in 1 : vector<4x31xbf16>, vector<4x1xbf16> -> vector<4x32xbf16>
    %137 = vector.shape_cast %133 : vector<1x32xi1> to vector<1x32xi1>
    %138 = vector.broadcast %137 : vector<1x32xi1> to vector<4x32xi1>
    %139 = arith.select %138, %136, %0 : vector<4x32xi1>, vector<4x32xbf16>
    %140 = arith.maximumf %131, %0 : vector<4x32xbf16>
    %141 = arith.maximumf %140, %139 : vector<4x32xbf16>
    %142 = tpu.concatenate %36, %51, %66, %78, %93, %108, %123, %141 in 0 : vector<8x32xbf16>, vector<8x32xbf16>, vector<8x32xbf16>, vector<8x32xbf16>, vector<8x32xbf16>, vector<8x32xbf16>, vector<8x32xbf16>, vector<4x32xbf16> -> vector<60x32xbf16>
    %c0_39 = arith.constant 0 : index
    %c0_40 = arith.constant 0 : index
    %143 = vector.load %arg3[%c0_39, %c0_40] : memref<16x60xbf16, #tpu.memory_space<vmem>>, vector<16x60xbf16>
    %cst_41 = arith.constant dense<0.000000e+00> : vector<16x32xf32>
    %144 = tpu.matmul %143, %142, %cst_41 {dimension_numbers = #tpu.dot_dimension_numbers<[1], [0], [0], [1], [0, 0, 1, 1], [], []>} : vector<16x60xbf16>, vector<60x32xbf16>, vector<16x32xf32> -> vector<16x32xf32>
    %c0_42 = arith.constant 0 : index
    %c0_43 = arith.constant 0 : index
    %145 = vector.load %arg4[%c0_42, %c0_43] : memref<16x32xf32, #tpu.memory_space<vmem>>, vector<16x32xf32>
    tpu.vector_store %arg4[%c0_42, %c0_43], %144 {strides = array<i32>} : memref<16x32xf32, #tpu.memory_space<vmem>>, vector<16x32xf32>,
    %cst_44 = arith.constant dense<0.000000e+00> : vector<16xf32>
    %146 = vector.multi_reduction <add>, %144, %cst_44 [1] : vector<16x32xf32> to vector<16xf32>
    %147 = vector.shape_cast %146 : vector<16xf32> to vector<16x1xf32>
    %148 = arith.mulf %144, %144 : vector<16x32xf32>
    %cst_45 = arith.constant dense<0.000000e+00> : vector<16xf32>
    %149 = vector.multi_reduction <add>, %148, %cst_45 [1] : vector<16x32xf32> to vector<16xf32>
    %150 = vector.shape_cast %149 : vector<16xf32> to vector<16x1xf32>
    %151 = tpu.concatenate %147, %150 in 1 : vector<16x1xf32>, vector<16x1xf32> -> vector<16x2xf32>
    %c0_46 = arith.constant 0 : index
    %c0_47 = arith.constant 0 : index
    %c0_48 = arith.constant 0 : index
    %152 = vector.load %arg5[%c0_46, %c0_47, %c0_48] : memref<1x16x2xf32, #tpu.memory_space<vmem>>, vector<1x16x2xf32>
    %153 = vector.shape_cast %152 : vector<1x16x2xf32> to vector<16x2xf32>
    %154 = vector.shape_cast %151 : vector<16x2xf32> to vector<1x16x2xf32>
    tpu.vector_store %arg5[%c0_46, %c0_47, %c0_48], %154 {strides = array<i32>} : memref<1x16x2xf32, #tpu.memory_space<vmem>>, vector<1x16x2xf32>,
    return
  }
  func.func @transform_0(%arg0: i32) -> (i32, i32) {
    %c0_i32 = arith.constant 0 : i32
    %c0_i32_0 = arith.constant 0 : i32
    return %c0_i32, %arg0 : i32, i32
  }
  func.func @transform_1(%arg0: i32) -> (i32, i32) {
    %c0_i32 = arith.constant 0 : i32
    %c0_i32_0 = arith.constant 0 : i32
    %c0_i32_1 = arith.constant 0 : i32
    return %c0_i32, %c0_i32_0 : i32, i32
  }
  func.func @transform_2(%arg0: i32) -> (i32, i32) {
    %c0_i32 = arith.constant 0 : i32
    %c0_i32_0 = arith.constant 0 : i32
    %c0_i32_1 = arith.constant 0 : i32
    return %c0_i32, %c0_i32_0 : i32, i32
  }
  func.func @transform_3(%arg0: i32) -> (i32, i32) {
    %c0_i32 = arith.constant 0 : i32
    %c0_i32_0 = arith.constant 0 : i32
    return %c0_i32, %arg0 : i32, i32
  }
  func.func @transform_4(%arg0: i32) -> (i32, i32, i32) {
    %c0_i32 = arith.constant 0 : i32
    %c0_i32_0 = arith.constant 0 : i32
    %c0_i32_1 = arith.constant 0 : i32
    return %arg0, %c0_i32, %c0_i32_0 : i32, i32, i32
  }
}

</mosaic_0001>

<bundles_post_ra>
// kernel: tpu_custom_call.1
= control target key start
LH: loop header
LB: loop body
LE: loop exit
PB: predicated region body
PF: predicated region fallthrough
CT: control target
= control target key end

     0   :  { %10 = vsyncpa [#allocation3], 0  ;;  %s542_s0 = inlined_call_operand.hbm [shape: bf16[4,32], index: 0, kind: input, shape index: {}]   ;;  %s543_s1 = inlined_call_operand.vmem [shape: bf16[8,4], index: 1, kind: input, shape index: {}]   ;;  %s544_s2 = inlined_call_operand.vmem [shape: bf16[16,60], index: 2, kind: input, shape index: {}]   ;;  %s545_s3 = inlined_call_operand.hbm [shape: f32[16,32], index: 3, kind: output, shape index: {0}]   ;;  %s546_s4 = inlined_call_operand.vmem [shape: f32[1,16,2], index: 4, kind: output, shape index: {1}]  }
   0x1   :  { %11 = vsyncpa [#allocation4], 0  ;;  %s426_s15 = smov [#allocation2]  }
   0x2   :  { %s18_s16 = sshll.u32 %s426_s15, 4  ;;  %s19_s16 = int_to_ptr.vmem [resolvable:$true] %s18_s16 }
   0x3   :  { %s390_s17 = scalar_lea.vmem %s19_s16, 32  ;;  %p395_p1 = scmp.lt.s32.totalorder %s19_s16, %s19_s16 }
   0x4   :  { %p391_p0 = scmp.ne.s32.totalorder %s19_s16, %s390_s17  ;;  %p396_p2 = scmp.lt.s32.totalorder %s390_s17, %s390_s17 }
   0x6   :  { %p397_p3 = por %p396_p2, %p395_p1 }
   0x8   :  { %p398_p4 = pnand %p397_p3, %p391_p0 }
   0xa   :  { %401 = shalt.err (!%p398_p4)
}
   0xb   :  { %21 = dma.hbm_to_vmem [thread:$0]  %s542_s0, 32, %s19_s16, [#allocation3]  }
   0xc   :  { %422 = dma.done.wait [#allocation3], 32  }
   0xd   :  { %423 = vsyncadd [#allocation3], 4294967264  ;;  %v427_v0 = vmov 0.0   ;;  %vm428_vm0 = vmmov 0   ;;  %v31_v1 = vlaneseq  ;;  %v429_v2 = vmov 1983009808  }
   0xe   :  { %349 = vmatprep.subr.bf16.mxu0 %v427_v0  ;;  %351 = vmatprep.mubr.msk.bf16.mxu0 %vm428_vm0, %v427_v0  ;;  %v191_v3 = vunpack.c.l.s4 %v429_v2  ;;  %vm50_vm1 = vcmask 1041408   ;;  %v30_v7 = vld [vmem:[#allocation2] sm:$0x3]  ;;  %vm46_vm2 = vcmask 31744   ;;  %s430_s21 = smov 1   ;;  %s431_s22 = smov 127  }
   0xf   :  { %355 = vmatprep.subr.bf16.mxu1 %v427_v0  ;;  %363 = vmatprep.mubr.msk.bf16.mxu1 %vm428_vm0, %v427_v0  ;;  %v194_v4 = vshrl.u32 %v31_v1, 7  ;;  %v52_v8 = vsel %vm50_vm1, %v30_v7, 0  ;;  %v45_v10 = vld [vmem:[%s543_s1] sm:$0xf]  ;;  %s432_s23 = smov 125   ;;  %s433_s24 = smov 2  }
  0x10   :  { %v192_v5 = vunpack.c.0.s8 %v191_v3  ;;  %350 = vmatpush3.bf16.msra.mxu0 %v52_v8  ;;  %s434_s1 = smov 126   ;;  %s435_s25 = smov 3   ;;  %v32_v16 = vand.u32 127, %v31_v1  ;;  %vm131_vm3 = vcmask 7168   ;;  %vm152_vm6 = vcmask 252928   ;;  %v381_v2 = vld [vmem:[%s544_s2] sm:$0xff]  }
  0x11   :  { %vm180_vm10 = vcmask 236544   ;;  %vm226_vm13 = vcmask 1043456   ;;  %vm253_vm14 = vcmask 1045504   ;;  %vm166_vm0 = vcmask 244736   ;;  %s437_s2 = smov [#allocation5]  }
  0x12   :  { %v195_v6 = vsub.s32 %v192_v5, %v194_v4  ;;  %v37_v17 = vand.u32 15, %v32_v16  ;;  %vm436_vm1 = vmmov 1   ;;  %s323_s28 = sshll.u32 %s437_s2, 4  ;;  %s324_s28 = int_to_ptr.vmem [resolvable:$true] %s323_s28 }
  0x13   :  { %352 = vmatmul.mubr.msk.bf16.vlgmr.msra.gmra.mxu0 %vm46_vm2, %v45_v10  ;;  %vm491_vm2 = vmpackc.low %vm436_vm1, %vm436_vm1  ;;  %s402_s29 = scalar_lea.vmem %s324_s28, 256  ;;  %p407_p6 = scmp.lt.s32.totalorder %s324_s28, %s324_s28 }
  0x14   :  { %v196_v9 = vrot.slane %v30_v7, %v195_v6  ;;  %vm188_vm4 = vcmp.ge.s32.totalorder %v37_v17, 1  ;;  %vm206_vm7 = vcmp.le.s32.totalorder %v37_v17, 14  ;;  %v174_v25 = vadd.s32 3, %v37_v17  ;;  %p403_p5 = scmp.ne.s32.totalorder %s324_s28, %s402_s29  ;;  %p408_p7 = scmp.lt.s32.totalorder %s402_s29, %s402_s29 }
  0x15   :  { %vm204_vm5 = vmpackc.low %vm188_vm4, %vm188_vm4  ;;  %v160_v27 = vadd.s32 2, %v37_v17  ;;  %v146_v28 = vadd.s32 1, %v37_v17  ;;  %v125_v33 = vadd.s32 4294967295, %v37_v17  ;;  %v111_v36 = vadd.s32 4294967294, %v37_v17 }
  0x16   :  { %197 = vrot.lane.b32.xlu0 %v196_v9, %s430_s21  ;;  %vm214_vm8 = vmpackc.low %vm206_vm7, %vm206_vm7  ;;  %vm176_vm9 = vcmp.lt.s32.totalorder %v174_v25, 16  ;;  %v95_v42 = vadd.s32 4294967293, %v37_v17  ;;  %p409_p8 = por %p408_p7, %p407_p6 }
  0x17   :  { %vm485_vm11 = vmpackc.low %vm176_vm9, %vm176_vm9  ;;  %vm162_vm12 = vcmp.lt.s32.totalorder %v160_v27, 16  ;;  %vm148_vm15 = vcmp.lt.s32.totalorder %v146_v28, 16  ;;  %vm117_vm9 = vcmask 15360  }
  0x18   :  { %vm495_vm4 = vmpackc.low %vm162_vm12, %vm162_vm12  ;;  %vm102_vm12 = vcmask 23552   ;;  %p410_p9 = pnand %p409_p8, %p403_p5 }
  0x19   :  { %vm500_vm7 = vmpackc.low %vm148_vm15, %vm148_vm15  ;;  %vm249_vm15 = vcmask 490496  }
  0x1a   :  { %207 = vrot.lane.b32.xlu0 %v196_v9, %s431_s22 }
  0x88   :  { %v198_v18 = vpop.permute.xlu0 %197 }
  0x89   :  { %v200_v19 = vsel %vm131_vm3, 0, %v198_v18 }
  0x8a   :  { %v205_v21 = vsel %vm204_vm5, %v200_v19, %v30_v7  ;;  %vm126_vm5 = vcmp.ge.s32.totalorder %v125_v33, 0 }
  0x8b   :  { %v216_v23 = vmax.bf16 %v205_v21, %v30_v7 }
  0x8c   :  { %v208_v20 = vpop.permute.xlu0 %207 }
  0x8d   :  { %v210_v22 = vsel %vm152_vm6, %v208_v20, 0 }
  0x8e   :  { %v215_v24 = vsel %vm214_vm8, %v210_v22, %v30_v7  ;;  %vm112_vm8 = vcmp.ge.s32.totalorder %v111_v36, 0 }
  0x8f   :  { %v217_v26 = vmax.bf16 %v216_v23, %v215_v24 }
  0x91   :  { %v225_v29 = vrot.slane %v217_v26, 4 }
  0xd3   :  { %v88_v11 = vpop.f32.mrf.mxu0 }
  0xd4   :  { %v475_v12 = vpack.c.bf16 %v88_v11, %v88_v11 }
  0xd5   :  { %v353_v13 = vpop.f32.mrf.mxu0 }
  0xd6   :  { %150 = vrot.lane.b32.xlu0 %v475_v12, %s431_s22  ;;  %178 = vrot.lane.b32.xlu1 %v475_v12, %s432_s23  ;;  %v145_v48 = vsel %vm491_vm2, %v475_v12, 0 }
  0xd7   :  { %v91_v14 = vpop.f32.mrf.mxu0  ;;  %v221_v56 = vrot.slane %v145_v48, 4 }
  0xd9   :  { %v354_v15 = vpop.f32.mrf.mxu0 }
  0xda   :  { %115 = vrot.lane.b32.xlu0 %v475_v12, %s433_s24  ;;  %164 = vrot.lane.b32.xlu1 %v475_v12, %s434_s1 }
  0xde   :  { %129 = vrot.lane.b32.xlu1 %v475_v12, %s430_s21 }
  0xe2   :  { %100 = vrot.lane.b32.xlu1 %v475_v12, %s435_s25 }
 0x148   :  { %v151_v31 = vpop.permute.xlu0 %150  ;;  %v179_v32 = vpop.permute.xlu1 %178 }
 0x149   :  { %v182_v34 = vsel %vm180_vm10, %v179_v32, 0  ;;  %v154_v44 = vsel %vm152_vm6, %v151_v31, 0  ;;  %vm137_vm10 = vmpackc.low %vm126_vm5, %vm126_vm5  ;;  %vm96_vm6 = vcmp.ge.s32.totalorder %v95_v42, 0 }
 0x14a   :  { %v187_v35 = vsel %vm485_vm11, %v182_v34, 0  ;;  %v159_v50 = vsel %vm500_vm7, %v154_v44, 0  ;;  %vm513_vm11 = vmpackc.low %vm112_vm8, %vm112_vm8 }
 0x14b   :  { %v241_v39 = vsel %vm226_vm13, %v187_v35, %v225_v29 }
 0x14c   :  { %v165_v40 = vpop.permute.xlu1 %164  ;;  %v254_v41 = vsel %vm253_vm14, %v241_v39, 0  ;;  %v116_v46 = vpop.permute.xlu0 %115  ;;  %vm109_vm14 = vmpackc.low %vm96_vm6, %vm96_vm6 }
 0x14d   :  { %v168_v45 = vsel %vm166_vm0, %v165_v40, 0  ;;  %356 = vmatpush3.bf16.msra.mxu1 %v254_v41  ;;  %v119_v53 = vsel %vm117_vm9, 0, %v116_v46  ;;  %vm297_vm0 = vcmask 261120  }
 0x14e   :  { %v173_v47 = vsel %vm495_vm4, %v168_v45, 0  ;;  %357 = vmatprep.subr.bf16.mxu1 %v427_v0  ;;  %v124_v59 = vsel %vm513_vm11, %v119_v53, 0 }
 0x14f   :  { %v223_v49 = vrot.slane %v173_v47, 4  ;;  %v219_v63 = vrot.slane %v124_v59, 4 }
 0x150   :  { %v130_v51 = vpop.permute.xlu1 %129 }
 0x151   :  { %v133_v54 = vsel %vm131_vm3, 0, %v130_v51  ;;  %v237_v55 = vsel %vm226_vm13, %v159_v50, %v223_v49 }
 0x152   :  { %v138_v57 = vsel %vm137_vm10, %v133_v54, 0  ;;  %358 = vmatpush3.bf16.msra.mxu1 %v237_v55 }
 0x153   :  { %359 = vmatprep.subr.bf16.mxu1 %v427_v0  ;;  %v233_v58 = vsel %vm226_vm13, %v138_v57, %v221_v56 }
 0x154   :  { %v101_v60 = vpop.permute.xlu1 %100 }
 0x155   :  { %v105_v61 = vsel %vm102_vm12, 0, %v101_v60 }
 0x156   :  { %v110_v62 = vsel %vm109_vm14, %v105_v61, 0  ;;  %360 = vmatpush3.bf16.msra.mxu1 %v233_v58 }
 0x157   :  { %361 = vmatprep.subr.bf16.mxu1 %v427_v0  ;;  %v229_v1 = vsel %vm226_vm13, %v110_v62, %v219_v63 }
 0x15a   :  { %362 = vmatpush3.bf16.msra.mxu1 %v229_v1 }
 0x15d   :  { %364 = vmatmul.mubr.msk.bf16.vlgmr.msra.gmra.mxu1 %vm249_vm15, %v381_v2 }
 0x21d   :  { %v290_v3 = vpop.f32.mrf.mxu1 }
 0x21e   :  { %298 = vst.msk [vmem:[#allocation5] sm:$0xff] %vm297_vm0, %v290_v3  ;;  %v300_v4 = vsel %vm297_vm0, %v290_v3, 0.0  ;;  %v306_v5 = vmul.f32 %v290_v3, %v290_v3 }
 0x21f   :  { %301 = vadd.xlane.f32.xlu0 %v300_v4  ;;  %v365_v6 = vpop.f32.mrf.mxu1 }
 0x220   :  { %v308_v8 = vsel %vm297_vm0, %v306_v5, 0.0 }
 0x221   :  { %v293_v7 = vpop.f32.mrf.mxu1 }
 0x222   :  { %299 = vst.msk [vmem:[#allocation5 + $0x8] sm:$0xff] %vm297_vm0, %v293_v7  ;;  %v303_v0 = vsel %vm297_vm0, %v293_v7, 0.0  ;;  %v307_v9 = vmul.f32 %v293_v7, %v293_v7 }
 0x223   :  { %309 = vadd.xlane.f32.xlu0 %v308_v8  ;;  %304 = vadd.xlane.f32.xlu1 %v303_v0  ;;  %v366_v10 = vpop.f32.mrf.mxu1 }
 0x224   :  { %v311_v11 = vsel %vm297_vm0, %v307_v9, 0.0 }
 0x227   :  { %312 = vadd.xlane.f32.xlu0 %v311_v11 }
 0x228   :  { %413 = shalt.err (!%p410_p9)
}
 0x229   :  { %s438_s30 = smov 128   ;;  %s439_s5 = smov 8  }
 0x22a   :  { %329 = dma.vmem_to_hbm [thread:$0]  %s324_s28, 256, %s545_s3, [#allocation4], %s438_s30, %s438_s30, %s439_s5  }
 0x2a8   :  { %v302_v12 = vpop.xlane.xlu0 %301 }
 0x2ac   :  { %v310_v13 = vpop.xlane.xlu0 %309  ;;  %v305_v15 = vpop.xlane.xlu1 %304 }
 0x2ad   :  { %v314_v14 = vsel %vm131_vm3, %v302_v12, %v310_v13 }
 0x2ae   :  { %316 = vst.msk [vmem:[%s546_s4] sm:$0xff] %vm117_vm9, %v314_v14 }
 0x2b0   :  { %v313_v16 = vpop.xlane.xlu0 %312 }
 0x2b1   :  { %v315_v17 = vsel %vm131_vm3, %v305_v15, %v313_v16 }
 0x2b2   :  { %317 = vst.msk [vmem:[%s546_s4 + $0x8] sm:$0xff] %vm117_vm9, %v315_v17 }
 0x2b3   :  { %424 = dma.done.wait [#allocation4], 256  }
 0x2b4   :  { %425 = vsyncadd [#allocation4], 4294967040 }
 0x2b5   :  { %337 = vsyncpa [#allocation3], 1 }
 0x2b6   :  { %338 = vsyncpa [#allocation4], 1 }

</bundles_post_ra>
